<compile_context>
chip_gen: v7x
topology: tpu7x:2x2x1
jax: 0.10.0
libtpu: 0.0.40
codegen_flags: <defaults>
</compile_context>

<pallas_src>
import jax
import jax.numpy as jnp
from jax.experimental import pallas as pl
from jax.experimental.pallas import tpu as pltpu


NET_ARCH = [77, 100, 100, 300, 100, 100, 100, 100, 100, 4]
N_LAYERS = len(NET_ARCH) - 1

LANE = 128
SUBLANE = 8


def _round_up(x, m):
    return (x + m - 1) // m * m


PAD_ARCH = [_round_up(d, LANE) for d in NET_ARCH]  # [128,128,128,384,128,...,128]
IN_PAD = PAD_ARCH[0]        # 128
OUT_PAD = PAD_ARCH[-1]      # 128
W_SLAB_COLS = max(PAD_ARCH[1:])                    # 384

W_ROW_OFFSETS = []
_off = 0
for _fin_p in PAD_ARCH[:-1]:
    W_ROW_OFFSETS.append(_off)
    _off += _fin_p
W_SLAB_ROWS = _off                                 # 1408 (all offsets multiples of 128)


def _fused_mlp_kernel(x_ref, w_ref, b_ref, o_ref):
    """Whole 9-layer MLP on one batch tile. Intermediates live in vregs only."""
    h = x_ref[...]  # (TB, 128) f32
    for i in range(N_LAYERS):
        fin_p, fout_p = PAD_ARCH[i], PAD_ARCH[i + 1]
        row = W_ROW_OFFSETS[i]
        # Static, 128-aligned slices of the resident weight/bias slabs (zero-cost views).
        w = w_ref[row:row + fin_p, 0:fout_p]           # (fin_p, fout_p)
        b = b_ref[i:i + 1, 0:fout_p]                   # (1, fout_p)
        y = jnp.dot(h, w, preferred_element_type=jnp.float32) + b
        if i < N_LAYERS - 1:
            y = jnp.maximum(y, 0.0)                    # f32 VPU epilogue (free under MXU)
        h = y
    o_ref[...] = h.astype(o_ref.dtype)


def pack_params(params):
    """Pack per-layer (w:(fin,fout), b:(1,fout)) into lane-dense, zero-padded slabs."""
    w_slab = jnp.zeros((W_SLAB_ROWS, W_SLAB_COLS), jnp.float32)
    b_slab = jnp.zeros((N_LAYERS, W_SLAB_COLS), jnp.float32)
    for i, (w, b) in enumerate(params):
        fin, fout = w.shape
        row = W_ROW_OFFSETS[i]
        w_slab = w_slab.at[row:row + fin, :fout].set(w.astype(jnp.float32))
        b_slab = b_slab.at[i, :fout].set(b.reshape(-1).astype(jnp.float32))
    return w_slab, b_slab


@jax.jit
def _forward_packed(x, w_slab, b_slab):
    # nn.Flatten()(x): flatten everything except the batch dim.
    x = x.reshape(x.shape[0], -1).astype(jnp.float32)
    B = x.shape[0]

    # Batch tiling: single block for small B, 256-row "parallel" tiles for big B.
    if B <= 256:
        b_pad = _round_up(max(B, SUBLANE), SUBLANE)
        tb = b_pad
    else:
        tb = 256
        b_pad = _round_up(B, tb)
    n_tiles = b_pad // tb

    x_p = jnp.zeros((b_pad, IN_PAD), jnp.float32).at[:B, :NET_ARCH[0]].set(x)

    out_p = pl.pallas_call(
        _fused_mlp_kernel,
        out_shape=jax.ShapeDtypeStruct((b_pad, OUT_PAD), jnp.float32),
        grid=(n_tiles,),
        in_specs=[
            pl.BlockSpec((tb, IN_PAD), lambda i: (i, 0)),
            pl.BlockSpec((W_SLAB_ROWS, W_SLAB_COLS), lambda i: (0, 0)),  # resident slab
            pl.BlockSpec((N_LAYERS, W_SLAB_COLS), lambda i: (0, 0)),     # resident biases
        ],
        out_specs=pl.BlockSpec((tb, OUT_PAD), lambda i: (i, 0)),
        compiler_params=pltpu.CompilerParams(
            dimension_semantics=("parallel",)),
    )(x_p, w_slab, b_slab)

    return out_p[:B, :NET_ARCH[-1]]


def mynn_forward(x, params):
    w_slab, b_slab = pack_params(params)
    return _forward_packed(x, w_slab, b_slab)


def init_params(key):
    """Deterministic init mimicking PyTorch nn.Linear default (U(-1/sqrt(in), 1/sqrt(in)))."""
    params = []
    for fin, fout in zip(NET_ARCH[:-1], NET_ARCH[1:]):
        key, kw, kb = jax.random.split(key, 3)
        bound = 1.0 / jnp.sqrt(jnp.float32(fin))
        w = jax.random.uniform(kw, (fin, fout), jnp.float32, -bound, bound)
        b = jax.random.uniform(kb, (1, fout), jnp.float32, -bound, bound)
        params.append((w, b))
    return params


def mynn_reference(x, params):
    # Pure-JAX reference for correctness checking.
    x = x.reshape(x.shape[0], -1).astype(jnp.float32)
    for i, (w, b) in enumerate(params):
        x = x @ w + b
        if i < len(params) - 1:
            x = jnp.maximum(x, 0.0)
    return x


if __name__ == "__main__":
    key = jax.random.PRNGKey(0)
    key, kx = jax.random.split(key)

    B = 2
    # Input: batch of flat 77-d feature vectors (Flatten is a no-op here).
    x = jax.random.normal(kx, (B, 77), jnp.float32)

    params = init_params(key)

    out = mynn_forward(x, params)
    out = jax.block_until_ready(out)

    ref = mynn_reference(x, params)
    assert out.shape == (B, 4), out.shape
    assert jnp.allclose(out, ref, atol=1e-3, rtol=1e-3), "mismatch vs reference"

    print("KERNEL_OK")
</pallas_src>

<mosaic_0001>
module attributes {stable_mosaic.version = 11 : i64} {
  func.func @_fused_mlp_kernel(%arg0: i32, %arg1: memref<8x128xf32, #tpu.memory_space<vmem>>, %arg2: memref<1408x384xf32, #tpu.memory_space<vmem>>, %arg3: memref<9x384xf32, #tpu.memory_space<vmem>>, %arg4: memref<8x128xf32, #tpu.memory_space<vmem>>) attributes {dimension_semantics = [#tpu.dimension_semantics<parallel>], iteration_bounds = array<i64: 1>, scalar_prefetch = 0 : i64, scratch_operands = 0 : i64, tpu.core_type = #tpu.core_type<tc>, window_params = [{transform_indices = @transform_0, window_bounds = array<i64: 8, 128>}, {pipeline_mode = #tpu.pipeline_mode<synchronous>, transform_indices = @transform_1, window_bounds = array<i64: 1408, 384>}, {pipeline_mode = #tpu.pipeline_mode<synchronous>, transform_indices = @transform_2, window_bounds = array<i64: 9, 384>}, {transform_indices = @transform_3, window_bounds = array<i64: 8, 128>}]} {
    %c0 = arith.constant 0 : index
    %c0_0 = arith.constant 0 : index
    %0 = vector.load %arg1[%c0, %c0_0] : memref<8x128xf32, #tpu.memory_space<vmem>>, vector<8x128xf32>
    %c0_1 = arith.constant 0 : index
    %c0_2 = arith.constant 0 : index
    %1 = vector.load %arg2[%c0_1, %c0_2] : memref<1408x384xf32, #tpu.memory_space<vmem>>, vector<128x128xf32>
    %c0_3 = arith.constant 0 : index
    %c0_4 = arith.constant 0 : index
    %2 = vector.load %arg3[%c0_3, %c0_4] : memref<9x384xf32, #tpu.memory_space<vmem>>, vector<1x128xf32>
    %cst = arith.constant dense<0.000000e+00> : vector<8x128xf32>
    %3 = tpu.matmul %0, %1, %cst {dimension_numbers = #tpu.dot_dimension_numbers<[1], [0], [0], [1], [0, 0, 1, 1], [], []>} : vector<8x128xf32>, vector<128x128xf32>, vector<8x128xf32> -> vector<8x128xf32>
    %4 = vector.broadcast %2 : vector<1x128xf32> to vector<8x128xf32>
    %5 = arith.addf %3, %4 : vector<8x128xf32>
    %cst_5 = arith.constant 0.000000e+00 : f32
    %6 = vector.broadcast %cst_5 : f32 to vector<8x128xf32>
    %7 = arith.maximumf %5, %6 : vector<8x128xf32>
    %c128 = arith.constant 128 : index
    %c0_6 = arith.constant 0 : index
    %8 = vector.load %arg2[%c128, %c0_6] : memref<1408x384xf32, #tpu.memory_space<vmem>>, vector<128x128xf32>
    %c1 = arith.constant 1 : index
    %c0_7 = arith.constant 0 : index
    %9 = vector.load %arg3[%c1, %c0_7] : memref<9x384xf32, #tpu.memory_space<vmem>>, vector<1x128xf32>
    %cst_8 = arith.constant dense<0.000000e+00> : vector<8x128xf32>
    %10 = tpu.matmul %7, %8, %cst_8 {dimension_numbers = #tpu.dot_dimension_numbers<[1], [0], [0], [1], [0, 0, 1, 1], [], []>} : vector<8x128xf32>, vector<128x128xf32>, vector<8x128xf32> -> vector<8x128xf32>
    %11 = vector.broadcast %9 : vector<1x128xf32> to vector<8x128xf32>
    %12 = arith.addf %10, %11 : vector<8x128xf32>
    %cst_9 = arith.constant 0.000000e+00 : f32
    %13 = vector.broadcast %cst_9 : f32 to vector<8x128xf32>
    %14 = arith.maximumf %12, %13 : vector<8x128xf32>
    %c256 = arith.constant 256 : index
    %c0_10 = arith.constant 0 : index
    %15 = vector.load %arg2[%c256, %c0_10] : memref<1408x384xf32, #tpu.memory_space<vmem>>, vector<128x384xf32>
    %c2 = arith.constant 2 : index
    %c0_11 = arith.constant 0 : index
    %16 = vector.load %arg3[%c2, %c0_11] : memref<9x384xf32, #tpu.memory_space<vmem>>, vector<1x384xf32>
    %cst_12 = arith.constant dense<0.000000e+00> : vector<8x384xf32>
    %17 = tpu.matmul %14, %15, %cst_12 {dimension_numbers = #tpu.dot_dimension_numbers<[1], [0], [0], [1], [0, 0, 1, 1], [], []>} : vector<8x128xf32>, vector<128x384xf32>, vector<8x384xf32> -> vector<8x384xf32>
    %18 = vector.broadcast %16 : vector<1x384xf32> to vector<8x384xf32>
    %19 = arith.addf %17, %18 : vector<8x384xf32>
    %cst_13 = arith.constant 0.000000e+00 : f32
    %20 = vector.broadcast %cst_13 : f32 to vector<8x384xf32>
    %21 = arith.maximumf %19, %20 : vector<8x384xf32>
    %c384 = arith.constant 384 : index
    %c0_14 = arith.constant 0 : index
    %22 = vector.load %arg2[%c384, %c0_14] : memref<1408x384xf32, #tpu.memory_space<vmem>>, vector<384x128xf32>
    %c3 = arith.constant 3 : index
    %c0_15 = arith.constant 0 : index
    %23 = vector.load %arg3[%c3, %c0_15] : memref<9x384xf32, #tpu.memory_space<vmem>>, vector<1x128xf32>
    %cst_16 = arith.constant dense<0.000000e+00> : vector<8x128xf32>
    %24 = tpu.matmul %21, %22, %cst_16 {dimension_numbers = #tpu.dot_dimension_numbers<[1], [0], [0], [1], [0, 0, 1, 1], [], []>} : vector<8x384xf32>, vector<384x128xf32>, vector<8x128xf32> -> vector<8x128xf32>
    %25 = vector.broadcast %23 : vector<1x128xf32> to vector<8x128xf32>
    %26 = arith.addf %24, %25 : vector<8x128xf32>
    %cst_17 = arith.constant 0.000000e+00 : f32
    %27 = vector.broadcast %cst_17 : f32 to vector<8x128xf32>
    %28 = arith.maximumf %26, %27 : vector<8x128xf32>
    %c768 = arith.constant 768 : index
    %c0_18 = arith.constant 0 : index
    %29 = vector.load %arg2[%c768, %c0_18] : memref<1408x384xf32, #tpu.memory_space<vmem>>, vector<128x128xf32>
    %c4 = arith.constant 4 : index
    %c0_19 = arith.constant 0 : index
    %30 = vector.load %arg3[%c4, %c0_19] : memref<9x384xf32, #tpu.memory_space<vmem>>, vector<1x128xf32>
    %cst_20 = arith.constant dense<0.000000e+00> : vector<8x128xf32>
    %31 = tpu.matmul %28, %29, %cst_20 {dimension_numbers = #tpu.dot_dimension_numbers<[1], [0], [0], [1], [0, 0, 1, 1], [], []>} : vector<8x128xf32>, vector<128x128xf32>, vector<8x128xf32> -> vector<8x128xf32>
    %32 = vector.broadcast %30 : vector<1x128xf32> to vector<8x128xf32>
    %33 = arith.addf %31, %32 : vector<8x128xf32>
    %cst_21 = arith.constant 0.000000e+00 : f32
    %34 = vector.broadcast %cst_21 : f32 to vector<8x128xf32>
    %35 = arith.maximumf %33, %34 : vector<8x128xf32>
    %c896 = arith.constant 896 : index
    %c0_22 = arith.constant 0 : index
    %36 = vector.load %arg2[%c896, %c0_22] : memref<1408x384xf32, #tpu.memory_space<vmem>>, vector<128x128xf32>
    %c5 = arith.constant 5 : index
    %c0_23 = arith.constant 0 : index
    %37 = vector.load %arg3[%c5, %c0_23] : memref<9x384xf32, #tpu.memory_space<vmem>>, vector<1x128xf32>
    %cst_24 = arith.constant dense<0.000000e+00> : vector<8x128xf32>
    %38 = tpu.matmul %35, %36, %cst_24 {dimension_numbers = #tpu.dot_dimension_numbers<[1], [0], [0], [1], [0, 0, 1, 1], [], []>} : vector<8x128xf32>, vector<128x128xf32>, vector<8x128xf32> -> vector<8x128xf32>
    %39 = vector.broadcast %37 : vector<1x128xf32> to vector<8x128xf32>
    %40 = arith.addf %38, %39 : vector<8x128xf32>
    %cst_25 = arith.constant 0.000000e+00 : f32
    %41 = vector.broadcast %cst_25 : f32 to vector<8x128xf32>
    %42 = arith.maximumf %40, %41 : vector<8x128xf32>
    %c1024 = arith.constant 1024 : index
    %c0_26 = arith.constant 0 : index
    %43 = vector.load %arg2[%c1024, %c0_26] : memref<1408x384xf32, #tpu.memory_space<vmem>>, vector<128x128xf32>
    %c6 = arith.constant 6 : index
    %c0_27 = arith.constant 0 : index
    %44 = vector.load %arg3[%c6, %c0_27] : memref<9x384xf32, #tpu.memory_space<vmem>>, vector<1x128xf32>
    %cst_28 = arith.constant dense<0.000000e+00> : vector<8x128xf32>
    %45 = tpu.matmul %42, %43, %cst_28 {dimension_numbers = #tpu.dot_dimension_numbers<[1], [0], [0], [1], [0, 0, 1, 1], [], []>} : vector<8x128xf32>, vector<128x128xf32>, vector<8x128xf32> -> vector<8x128xf32>
    %46 = vector.broadcast %44 : vector<1x128xf32> to vector<8x128xf32>
    %47 = arith.addf %45, %46 : vector<8x128xf32>
    %cst_29 = arith.constant 0.000000e+00 : f32
    %48 = vector.broadcast %cst_29 : f32 to vector<8x128xf32>
    %49 = arith.maximumf %47, %48 : vector<8x128xf32>
    %c1152 = arith.constant 1152 : index
    %c0_30 = arith.constant 0 : index
    %50 = vector.load %arg2[%c1152, %c0_30] : memref<1408x384xf32, #tpu.memory_space<vmem>>, vector<128x128xf32>
    %c7 = arith.constant 7 : index
    %c0_31 = arith.constant 0 : index
    %51 = vector.load %arg3[%c7, %c0_31] : memref<9x384xf32, #tpu.memory_space<vmem>>, vector<1x128xf32>
    %cst_32 = arith.constant dense<0.000000e+00> : vector<8x128xf32>
    %52 = tpu.matmul %49, %50, %cst_32 {dimension_numbers = #tpu.dot_dimension_numbers<[1], [0], [0], [1], [0, 0, 1, 1], [], []>} : vector<8x128xf32>, vector<128x128xf32>, vector<8x128xf32> -> vector<8x128xf32>
    %53 = vector.broadcast %51 : vector<1x128xf32> to vector<8x128xf32>
    %54 = arith.addf %52, %53 : vector<8x128xf32>
    %cst_33 = arith.constant 0.000000e+00 : f32
    %55 = vector.broadcast %cst_33 : f32 to vector<8x128xf32>
    %56 = arith.maximumf %54, %55 : vector<8x128xf32>
    %c1280 = arith.constant 1280 : index
    %c0_34 = arith.constant 0 : index
    %57 = vector.load %arg2[%c1280, %c0_34] : memref<1408x384xf32, #tpu.memory_space<vmem>>, vector<128x128xf32>
    %c8 = arith.constant 8 : index
    %c0_35 = arith.constant 0 : index
    %58 = vector.load %arg3[%c8, %c0_35] : memref<9x384xf32, #tpu.memory_space<vmem>>, vector<1x128xf32>
    %cst_36 = arith.constant dense<0.000000e+00> : vector<8x128xf32>
    %59 = tpu.matmul %56, %57, %cst_36 {dimension_numbers = #tpu.dot_dimension_numbers<[1], [0], [0], [1], [0, 0, 1, 1], [], []>} : vector<8x128xf32>, vector<128x128xf32>, vector<8x128xf32> -> vector<8x128xf32>
    %60 = vector.broadcast %58 : vector<1x128xf32> to vector<8x128xf32>
    %61 = arith.addf %59, %60 : vector<8x128xf32>
    %c0_37 = arith.constant 0 : index
    %c0_38 = arith.constant 0 : index
    %62 = vector.load %arg4[%c0_37, %c0_38] : memref<8x128xf32, #tpu.memory_space<vmem>>, vector<8x128xf32>
    tpu.vector_store %arg4[%c0_37, %c0_38], %61 {strides = array<i32>} : memref<8x128xf32, #tpu.memory_space<vmem>>, vector<8x128xf32>,
    return
  }
  func.func @transform_0(%arg0: i32) -> (i32, i32) {
    %c0_i32 = arith.constant 0 : i32
    %c0_i32_0 = arith.constant 0 : i32
    return %arg0, %c0_i32 : i32, i32
  }
  func.func @transform_1(%arg0: i32) -> (i32, i32) {
    %c0_i32 = arith.constant 0 : i32
    %c0_i32_0 = arith.constant 0 : i32
    %c0_i32_1 = arith.constant 0 : i32
    return %c0_i32, %c0_i32_0 : i32, i32
  }
  func.func @transform_2(%arg0: i32) -> (i32, i32) {
    %c0_i32 = arith.constant 0 : i32
    %c0_i32_0 = arith.constant 0 : i32
    %c0_i32_1 = arith.constant 0 : i32
    return %c0_i32, %c0_i32_0 : i32, i32
  }
  func.func @transform_3(%arg0: i32) -> (i32, i32) {
    %c0_i32 = arith.constant 0 : i32
    %c0_i32_0 = arith.constant 0 : i32
    return %arg0, %c0_i32 : i32, i32
  }
}

</mosaic_0001>

<bundles_post_ra>
// kernel: _forward_packed.1
= control target key start
LH: loop header
LB: loop body
LE: loop exit
PB: predicated region body
PF: predicated region fallthrough
CT: control target
= control target key end

     0   :  { %8 = vsyncpa [#allocation3], 0  ;;  %s2051_s0 = inlined_call_operand.vmem [shape: f32[8,128], index: 0, kind: input, shape index: {}]   ;;  %s2052_s1 = inlined_call_operand.hbm [shape: f32[1408,384], index: 1, kind: input, shape index: {}]   ;;  %s2053_s2 = inlined_call_operand.hbm [shape: f32[9,384], index: 2, kind: input, shape index: {}]   ;;  %s2054_s3 = inlined_call_operand.vmem [shape: f32[8,128], index: 3, kind: output, shape index: {}]  }
   0x1   :  { %9 = vsyncpa [#allocation5], 0  ;;  %s1903_s12 = smov [#allocation2]   ;;  %s1855_s16 = scalar_lea.hbm %s2052_s1, 67584 }
   0x2   :  { %s17_s13 = sshll.u32 %s1903_s12, 4  ;;  %p1856_p0 = scmp.ne.s32.totalorder %s2052_s1, %s1855_s16  ;;  %s18_s13 = int_to_ptr.vmem [resolvable:$true] %s17_s13 }
   0x3   :  { %p1859_p1 = scmp.lt.u32.totalorder %s1855_s16, %s2052_s1 }
   0x5   :  { %p1861_p2 = pnand %p1859_p1, %p1856_p0 }
   0x7   :  { %1864 = shalt.err (!%p1861_p2)
}
   0x8   :  { %s1865_s21 = scalar_lea.vmem %s18_s13, 67584  ;;  %p1870_p4 = scmp.lt.s32.totalorder %s18_s13, %s18_s13 }
   0x9   :  { %p1866_p3 = scmp.ne.s32.totalorder %s18_s13, %s1865_s21  ;;  %p1871_p5 = scmp.lt.s32.totalorder %s1865_s21, %s1865_s21 }
   0xb   :  { %p1872_p6 = por %p1871_p5, %p1870_p4 }
   0xd   :  { %p1873_p7 = pnand %p1872_p6, %p1866_p3 }
   0xf   :  { %1876 = shalt.err (!%p1873_p7)
}
  0x10   :  { %s1904_s22 = smov 384   ;;  %s1905_s23 = smov 24  }
  0x11   :  { %23 = dma.hbm_to_vmem [thread:$0]  %s2052_s1, 67584, %s18_s13, [#allocation3], %s1904_s22, %s1904_s22, %s1905_s23  }
  0x12   :  { %s1906_s26 = smov [#allocation4]   ;;  %s1877_s30 = scalar_lea.hbm %s2053_s2, 768 }
  0x13   :  { %s29_s27 = sshll.u32 %s1906_s26, 4  ;;  %p1878_p8 = scmp.ne.s32.totalorder %s2053_s2, %s1877_s30  ;;  %s30_s27 = int_to_ptr.vmem [resolvable:$true] %s29_s27 }
  0x14   :  { %p1881_p9 = scmp.lt.u32.totalorder %s1877_s30, %s2053_s2 }
  0x16   :  { %p1883_p10 = pnand %p1881_p9, %p1878_p8 }
  0x18   :  { %1886 = shalt.err (!%p1883_p10)
}
  0x19   :  { %s1887_s8 = scalar_lea.vmem %s30_s27, 768  ;;  %p1892_p12 = scmp.lt.s32.totalorder %s30_s27, %s30_s27 }
  0x1a   :  { %p1888_p11 = scmp.ne.s32.totalorder %s30_s27, %s1887_s8  ;;  %p1893_p13 = scmp.lt.s32.totalorder %s1887_s8, %s1887_s8 }
  0x1c   :  { %p1894_p0 = por %p1893_p13, %p1892_p12 }
  0x1e   :  { %p1895_p1 = pnand %p1894_p0, %p1888_p11 }
  0x20   :  { %1898 = shalt.err (!%p1895_p1)
}
  0x21   :  { %35 = dma.hbm_to_vmem [thread:$0]  %s2053_s2, 768, %s30_s27, [#allocation5], %s1904_s22, %s1904_s22, %s1905_s23  }
  0x22   :  { %1899 = dma.done.wait [#allocation3], 67584  }
  0x23   :  { %1900 = vsyncadd [#allocation3], 4294899712 }
  0x24   :  { %1901 = dma.done.wait [#allocation5], 768  }
  0x25   :  { %1902 = vsyncadd [#allocation5], 4294966528  ;;  %v1907_v0 = vmov 0.0|0.0   ;;  %vm1908_vm0 = vmmov 0   ;;  %v1909_v1 = vmov 0.0   ;;  %v43_v2 = vld [vmem:[#allocation2] sm:$0xff] }
  0x26   :  { %1568 = vmatprep.subr.bf16.mxu0 %v1907_v0  ;;  %1285 = vmatprep.mubr.msk.f32.mxu0 %vm1908_vm0, %v1909_v1  ;;  %v44_v3 = vld [vmem:[#allocation2 + $0x18] sm:$0xff]  ;;  %v45_v4 = vld [vmem:[#allocation2 + $0x30] sm:$0xff]  ;;  %v46_v6 = vld [vmem:[#allocation2 + $0x48] sm:$0xff] }
  0x27   :  { %1592 = vmatprep.subr.bf16.mxu1 %v1907_v0  ;;  %1320 = vmatprep.mubr.msk.f32.mxu1 %vm1908_vm0, %v1909_v1  ;;  %v1569_v5 = vpack.c.bf16 %v44_v3, %v43_v2  ;;  %v1572_v7 = vpack.c.bf16 %v46_v6, %v45_v4  ;;  %v47_v8 = vld [vmem:[#allocation2 + $0x60] sm:$0xff]  ;;  %v48_v9 = vld [vmem:[#allocation2 + $0x78] sm:$0xff]  ;;  %v133_v12 = vld [vmem:[#allocation2 + $0x1b0] sm:$0xff] }
  0x28   :  { %v131_v10 = vld [vmem:[#allocation2 + $0x180] sm:$0xff]  ;;  %v132_v11 = vld [vmem:[#allocation2 + $0x198] sm:$0xff]  ;;  %v134_v13 = vld [vmem:[#allocation2 + $0x1c8] sm:$0xff]  ;;  %v1575_v14 = vpack.c.bf16 %v48_v9, %v47_v8 }
  0x29   :  { %1570 = vmatpush3.bf16.msra.mxu0 %v1569_v5  ;;  %v1593_v15 = vpack.c.bf16 %v132_v11, %v131_v10  ;;  %v49_v16 = vld [vmem:[#allocation2 + $0x90] sm:$0xff]  ;;  %v50_v17 = vld [vmem:[#allocation2 + $0xa8] sm:$0xff]  ;;  %v1596_v18 = vpack.c.bf16 %v134_v13, %v133_v12  ;;  %v135_v19 = vld [vmem:[#allocation2 + $0x1e0] sm:$0xff] }
  0x2a   :  { %1571 = vmatprep.subr.bf16.mxu0 %v1907_v0  ;;  %v136_v20 = vld [vmem:[#allocation2 + $0x1f8] sm:$0xff]  ;;  %v1578_v21 = vpack.c.bf16 %v50_v17, %v49_v16  ;;  %v51_v22 = vld [vmem:[#allocation2 + $0xc0] sm:$0xff]  ;;  %v137_v25 = vld [vmem:[#allocation2 + $0x210] sm:$0xff] }
  0x2b   :  { %1594 = vmatpush3.bf16.msra.mxu1 %v1593_v15  ;;  %v52_v23 = vld [vmem:[#allocation2 + $0xd8] sm:$0xff]  ;;  %v1599_v24 = vpack.c.bf16 %v136_v20, %v135_v19  ;;  %v138_v26 = vld [vmem:[#allocation2 + $0x228] sm:$0xff]  ;;  %v53_v28 = vld [vmem:[#allocation2 + $0xf0] sm:$0xff] }
  0x2c   :  { %1595 = vmatprep.subr.bf16.mxu1 %v1907_v0  ;;  %v1581_v27 = vpack.c.bf16 %v52_v23, %v51_v22  ;;  %v54_v29 = vld [vmem:[#allocation2 + $0x108] sm:$0xff]  ;;  %v1602_v30 = vpack.c.bf16 %v138_v26, %v137_v25  ;;  %v139_v31 = vld [vmem:[#allocation2 + $0x240] sm:$0xff]  ;;  %v140_v32 = vld [vmem:[#allocation2 + $0x258] sm:$0xff] }
  0x2d   :  { %1573 = vmatpush3.bf16.msra.mxu0 %v1572_v7  ;;  %v1584_v33 = vpack.c.bf16 %v54_v29, %v53_v28  ;;  %v55_v34 = vld [vmem:[#allocation2 + $0x120] sm:$0xff]  ;;  %v56_v35 = vld [vmem:[#allocation2 + $0x138] sm:$0xff]  ;;  %v1605_v36 = vpack.c.bf16 %v140_v32, %v139_v31  ;;  %v141_v37 = vld [vmem:[#allocation2 + $0x270] sm:$0xff] }
  0x2e   :  { %1574 = vmatprep.subr.bf16.mxu0 %v1907_v0  ;;  %v142_v38 = vld [vmem:[#allocation2 + $0x288] sm:$0xff]  ;;  %v1587_v39 = vpack.c.bf16 %v56_v35, %v55_v34  ;;  %v57_v40 = vld [vmem:[#allocation2 + $0x150] sm:$0xff]  ;;  %v143_v43 = vld [vmem:[#allocation2 + $0x2a0] sm:$0xff] }
  0x2f   :  { %1597 = vmatpush3.bf16.msra.mxu1 %v1596_v18  ;;  %v58_v41 = vld [vmem:[#allocation2 + $0x168] sm:$0xff]  ;;  %v1608_v42 = vpack.c.bf16 %v142_v38, %v141_v37  ;;  %v144_v44 = vld [vmem:[#allocation2 + $0x2b8] sm:$0xff]  ;;  %v42_v47 = vld [vmem:[%s2051_s0] sm:$0xff] }
  0x30   :  { %1598 = vmatprep.subr.bf16.mxu1 %v1907_v0  ;;  %v1590_v45 = vpack.c.bf16 %v58_v41, %v57_v40  ;;  %v1611_v46 = vpack.c.bf16 %v144_v44, %v143_v43  ;;  %v145_v48 = vld [vmem:[#allocation2 + $0x2d0] sm:$0xff]  ;;  %v146_v49 = vld [vmem:[#allocation2 + $0x2e8] sm:$0xff]  ;;  %v223_v52 = vld [vmem:[#allocation2 + $0x320] sm:$0xff] }
  0x31   :  { %1576 = vmatpush3.bf16.msra.mxu0 %v1575_v14  ;;  %v1614_v50 = vpack.c.bf16 %v146_v49, %v145_v48  ;;  %v220_v51 = vld [vmem:[#allocation2 + $0x308] sm:$0xff]  ;;  %v219_v53 = vld [vmem:[#allocation2 + $0x300] sm:$0xff]  ;;  %v222_v55 = vld [vmem:[#allocation2 + $0x318] sm:$0xff] }
  0x32   :  { %1577 = vmatprep.subr.bf16.mxu0 %v1907_v0  ;;  %v1616_v54 = vpack.c.bf16 %v223_v52, %v220_v51  ;;  %v1618_v56 = vpack.c.bf16 %v222_v55, %v219_v53  ;;  %v226_v57 = vld [vmem:[#allocation2 + $0x338] sm:$0xff]  ;;  %v229_v58 = vld [vmem:[#allocation2 + $0x350] sm:$0xff]  ;;  %v228_v61 = vld [vmem:[#allocation2 + $0x348] sm:$0xff] }
  0x33   :  { %1600 = vmatpush3.bf16.msra.mxu1 %v1599_v24  ;;  %v225_v59 = vld [vmem:[#allocation2 + $0x330] sm:$0xff]  ;;  %v1620_v60 = vpack.c.bf16 %v229_v58, %v226_v57  ;;  %v232_v63 = vld [vmem:[#allocation2 + $0x368] sm:$0xff]  ;;  %v235_v2 = vld [vmem:[#allocation2 + $0x380] sm:$0xff] }
  0x34   :  { %1601 = vmatprep.subr.bf16.mxu1 %v1907_v0  ;;  %v1622_v62 = vpack.c.bf16 %v228_v61, %v225_v59  ;;  %v1624_v3 = vpack.c.bf16 %v235_v2, %v232_v63  ;;  %v231_v4 = vld [vmem:[#allocation2 + $0x360] sm:$0xff]  ;;  %v234_v5 = vld [vmem:[#allocation2 + $0x378] sm:$0xff]  ;;  %v241_v8 = vld [vmem:[#allocation2 + $0x3b0] sm:$0xff] }
  0x35   :  { %1579 = vmatpush3.bf16.msra.mxu0 %v1578_v21  ;;  %v1626_v6 = vpack.c.bf16 %v234_v5, %v231_v4  ;;  %v238_v7 = vld [vmem:[#allocation2 + $0x398] sm:$0xff]  ;;  %v237_v10 = vld [vmem:[#allocation2 + $0x390] sm:$0xff]  ;;  %v240_v11 = vld [vmem:[#allocation2 + $0x3a8] sm:$0xff] }
  0x36   :  { %1580 = vmatprep.subr.bf16.mxu0 %v1907_v0  ;;  %v1628_v9 = vpack.c.bf16 %v241_v8, %v238_v7  ;;  %v1630_v12 = vpack.c.bf16 %v240_v11, %v237_v10  ;;  %v244_v13 = vld [vmem:[#allocation2 + $0x3c8] sm:$0xff]  ;;  %v247_v14 = vld [vmem:[#allocation2 + $0x3e0] sm:$0xff]  ;;  %v246_v17 = vld [vmem:[#allocation2 + $0x3d8] sm:$0xff] }
  0x37   :  { %1603 = vmatpush3.bf16.msra.mxu1 %v1602_v30  ;;  %v1632_v15 = vpack.c.bf16 %v247_v14, %v244_v13  ;;  %v243_v16 = vld [vmem:[#allocation2 + $0x3c0] sm:$0xff]  ;;  %v250_v19 = vld [vmem:[#allocation2 + $0x3f8] sm:$0xff]  ;;  %v253_v20 = vld [vmem:[#allocation2 + $0x410] sm:$0xff] }
  0x38   :  { %1604 = vmatprep.subr.bf16.mxu1 %v1907_v0  ;;  %v1634_v18 = vpack.c.bf16 %v246_v17, %v243_v16  ;;  %v1636_v21 = vpack.c.bf16 %v253_v20, %v250_v19  ;;  %v249_v22 = vld [vmem:[#allocation2 + $0x3f0] sm:$0xff]  ;;  %v252_v23 = vld [vmem:[#allocation2 + $0x408] sm:$0xff]  ;;  %v259_v26 = vld [vmem:[#allocation2 + $0x440] sm:$0xff] }
  0x39   :  { %1582 = vmatpush3.bf16.msra.mxu0 %v1581_v27  ;;  %v1638_v24 = vpack.c.bf16 %v252_v23, %v249_v22  ;;  %v256_v25 = vld [vmem:[#allocation2 + $0x428] sm:$0xff]  ;;  %v255_v28 = vld [vmem:[#allocation2 + $0x420] sm:$0xff]  ;;  %v258_v29 = vld [vmem:[#allocation2 + $0x438] sm:$0xff] }
  0x3a   :  { %1583 = vmatprep.subr.bf16.mxu0 %v1907_v0  ;;  %v1640_v27 = vpack.c.bf16 %v259_v26, %v256_v25  ;;  %v1642_v30 = vpack.c.bf16 %v258_v29, %v255_v28  ;;  %v59_v31 = vld [vmem:[#allocation4] ss:$0 sm:$0xff]  ;;  %v221_v32 = vld [vmem:[#allocation2 + $0x310] sm:$0xff]  ;;  %v230_v40 = vld [vmem:[#allocation2 + $0x358] sm:$0xff] }
  0x3b   :  { %1606 = vmatpush3.bf16.msra.mxu1 %v1605_v36  ;;  %v236_v43 = vld [vmem:[#allocation2 + $0x388] sm:$0xff]  ;;  %v245_v48 = vld [vmem:[#allocation2 + $0x3d0] sm:$0xff]  ;;  %v251_v51 = vld [vmem:[#allocation2 + $0x400] sm:$0xff] }
  0x3c   :  { %1607 = vmatprep.subr.bf16.mxu1 %v1907_v0  ;;  %v248_v49 = vld [vmem:[#allocation2 + $0x3e8] sm:$0xff]  ;;  %v254_v52 = vld [vmem:[#allocation2 + $0x418] sm:$0xff]  ;;  %v265_v58 = vld [vmem:[#allocation2 + $0x470] sm:$0xff] }
  0x3d   :  { %1585 = vmatpush3.bf16.msra.mxu0 %v1584_v33  ;;  %v224_v33 = vld [vmem:[#allocation2 + $0x328] sm:$0xff]  ;;  %v1664_v53 = vpack.c.bf16 %v254_v52, %v251_v51  ;;  %v262_v57 = vld [vmem:[#allocation2 + $0x458] sm:$0xff]  ;;  %v445_v4 = vld [vmem:[#allocation2 + $0x600] sm:$0xff] }
  0x3e   :  { %1586 = vmatprep.subr.bf16.mxu0 %v1907_v0  ;;  %v1649_v37 = vpack.c.bf16 %v224_v33, %v221_v32  ;;  %v260_v55 = vld [vmem:[#allocation2 + $0x448] sm:$0xff]  ;;  %v1644_v59 = vpack.c.bf16 %v265_v58, %v262_v57  ;;  %v266_v2 = vld [vmem:[#allocation2 + $0x478] sm:$0xff]  ;;  %v147_v7 = vld [vmem:[#allocation4 + $0x1] ss:$0 sm:$0xff] }
  0x3f   :  { %1609 = vmatpush3.bf16.msra.mxu1 %v1608_v42  ;;  %v233_v42 = vld [vmem:[#allocation2 + $0x370] sm:$0xff]  ;;  %v264_v61 = vld [vmem:[#allocation2 + $0x468] sm:$0xff]  ;;  %v446_v5 = vld [vmem:[#allocation2 + $0x618] sm:$0xff] }
  0x40   :  { %1610 = vmatprep.subr.bf16.mxu1 %v1907_v0  ;;  %v1655_v44 = vpack.c.bf16 %v236_v43, %v233_v42  ;;  %v461_v8 = vld [vmem:[#allocation2 + $0x780] sm:$0xff]  ;;  %v430_v11 = vld [vmem:[#allocation2 + $0x498] sm:$0xff]  ;;  %v447_v13 = vld [vmem:[#allocation2 + $0x630] sm:$0xff] }
  0x41   :  { %1588 = vmatpush3.bf16.msra.mxu0 %v1587_v39  ;;  %v227_v39 = vld [vmem:[#allocation2 + $0x340] sm:$0xff]  ;;  %v448_v14 = vld [vmem:[#allocation2 + $0x648] sm:$0xff]  ;;  %v463_v19 = vld [vmem:[#allocation2 + $0x7b0] sm:$0xff] }
  0x42   :  { %1589 = vmatprep.subr.bf16.mxu0 %v1907_v0  ;;  %v1652_v41 = vpack.c.bf16 %v230_v40, %v227_v39  ;;  %v429_v10 = vld [vmem:[#allocation2 + $0x480] sm:$0xff]  ;;  %v1676_v22 = vpack.c.bf16 %v448_v14, %v447_v13  ;;  %v431_v23 = vld [vmem:[#allocation2 + $0x4b0] sm:$0xff]  ;;  %v450_v26 = vld [vmem:[#allocation2 + $0x678] sm:$0xff] }
  0x43   :  { %1612 = vmatpush3.bf16.msra.mxu1 %v1611_v46  ;;  %v242_v46 = vld [vmem:[#allocation2 + $0x3b8] sm:$0xff]  ;;  %v449_v25 = vld [vmem:[#allocation2 + $0x660] sm:$0xff]  ;;  %v468_v39 = vld [vmem:[#allocation2 + $0x828] sm:$0xff] }
  0x44   :  { %1613 = vmatprep.subr.bf16.mxu1 %v1907_v0  ;;  %v465_v29 = vld [vmem:[#allocation2 + $0x7e0] sm:$0xff]  ;;  %v434_v33 = vld [vmem:[#allocation2 + $0x4f8] sm:$0xff]  ;;  %v436_v42 = vld [vmem:[#allocation2 + $0x528] sm:$0xff] }
  0x45   :  { %1591 = vmatpush3.bf16.msra.mxu0 %v1590_v45  ;;  %v239_v45 = vld [vmem:[#allocation2 + $0x3a0] sm:$0xff]  ;;  %v438_v51 = vld [vmem:[#allocation2 + $0x558] sm:$0xff]  ;;  %v455_v52 = vld [vmem:[#allocation2 + $0x6f0] sm:$0xff] }
  0x46   :  { %1617 = vmatprep.subr.bf16.mxu0 %v1616_v54  ;;  %v257_v54 = vld [vmem:[#allocation2 + $0x430] sm:$0xff]  ;;  %v433_v32 = vld [vmem:[#allocation2 + $0x4e0] sm:$0xff]  ;;  %v472_v57 = vld [vmem:[#allocation2 + $0x888] sm:$0xff] }
  0x47   :  { %1615 = vmatpush3.bf16.msra.mxu1 %v1614_v50  ;;  %v1661_v50 = vpack.c.bf16 %v248_v49, %v245_v48  ;;  %v453_v43 = vld [vmem:[#allocation2 + $0x6c0] sm:$0xff]  ;;  %v470_v48 = vld [vmem:[#allocation2 + $0x858] sm:$0xff]  ;;  %v459_v13 = vld [vmem:[#allocation2 + $0x750] sm:$0xff] }
  0x48   :  { %1286 = vmatmul.mubr.f32.vlgmr.msra.gmra.mrb[0].mxu0 %v42_v47  ;;  %1648 = vmatprep.subr.bf16.mxu1 %v1907_v0  ;;  %v1658_v47 = vpack.c.bf16 %v242_v46, %v239_v45  ;;  %v460_v14 = vld [vmem:[#allocation2 + $0x768] sm:$0xff] }
  0x49   :  { %349 = vmatprep.mubr.f32.mxu0 %v1909_v1  ;;  %1619 = vmatpush1.bf16.msra.mxu0 %v1618_v56  ;;  %v1667_v56 = vpack.c.bf16 %v260_v55, %v257_v54 }
  0x4a   :  { %1621 = vmatprep.subr.bf16.mxu0 %v1620_v60  ;;  %v261_v60 = vld [vmem:[#allocation2 + $0x450] sm:$0xff] }
  0x4b   :  { %v1646_v63 = vpack.c.bf16 %v264_v61, %v261_v60  ;;  %v440_v60 = vld [vmem:[#allocation2 + $0x588] sm:$0xff]  ;;  %v457_v61 = vld [vmem:[#allocation2 + $0x720] sm:$0xff] }
  0x4d   :  { %1623 = vmatpush1.bf16.msra.mxu0 %v1622_v62  ;;  %v263_v62 = vld [vmem:[#allocation2 + $0x460] sm:$0xff] }
  0x4e   :  { %1625 = vmatprep.subr.bf16.mxu0 %v1624_v3  ;;  %v1670_v3 = vpack.c.bf16 %v266_v2, %v263_v62  ;;  %v458_v62 = vld [vmem:[#allocation2 + $0x738] sm:$0xff] }
  0x51   :  { %1627 = vmatpush1.bf16.msra.mxu0 %v1626_v6  ;;  %v1672_v6 = vpack.c.bf16 %v446_v5, %v445_v4  ;;  %v474_v4 = vld [vmem:[#allocation2 + $0x8b8] sm:$0xff]  ;;  %v1696_v5 = vpack.c.bf16 %v458_v62, %v457_v61  ;;  %v707_v62 = vld [vmem:[#allocation2 + $0xa80] sm:$0xff] }
  0x52   :  { %1629 = vmatprep.subr.bf16.mxu0 %v1628_v9  ;;  %v462_v9 = vld [vmem:[#allocation2 + $0x798] sm:$0xff] }
  0x53   :  { %v1705_v17 = vpack.c.bf16 %v462_v9, %v461_v8  ;;  %v442_v8 = vld [vmem:[#allocation2 + $0x5b8] sm:$0xff] }
  0x55   :  { %1631 = vmatpush1.bf16.msra.mxu0 %v1630_v12 }
  0x56   :  { %1633 = vmatprep.subr.bf16.mxu0 %v1632_v15 }
  0x59   :  { %1635 = vmatpush1.bf16.msra.mxu0 %v1634_v18  ;;  %v1674_v18 = vpack.c.bf16 %v430_v11, %v429_v10  ;;  %v475_v10 = vld [vmem:[#allocation2 + $0x8d0] sm:$0xff]  ;;  %v476_v11 = vld [vmem:[#allocation2 + $0x8e8] sm:$0xff] }
  0x5a   :  { %1637 = vmatprep.subr.bf16.mxu0 %v1636_v21  ;;  %v464_v21 = vld [vmem:[#allocation2 + $0x7c8] sm:$0xff] }
  0x5d   :  { %1639 = vmatpush1.bf16.msra.mxu0 %v1638_v24  ;;  %v432_v24 = vld [vmem:[#allocation2 + $0x4c8] sm:$0xff] }
  0x5e   :  { %1641 = vmatprep.subr.bf16.mxu0 %v1640_v27  ;;  %v1708_v27 = vpack.c.bf16 %v464_v21, %v463_v19  ;;  %v1678_v28 = vpack.c.bf16 %v432_v24, %v431_v23  ;;  %v270_v19 = vlaneseq  ;;  %v268_v23 = vld [vmem:[#allocation4 + $0x2] ss:$8 sm:$0x7] }
  0x61   :  { %1643 = vmatpush1.bf16.msra.mxu0 %v1642_v30  ;;  %v466_v30 = vld [vmem:[#allocation2 + $0x7f8] sm:$0xff] }
  0x62   :  { %1645 = vmatprep.subr.bf16.mxu0 %v1644_v59  ;;  %v439_v59 = vld [vmem:[#allocation2 + $0x570] sm:$0xff] }
  0x63   :  { %v1694_v2 = vpack.c.bf16 %v440_v60, %v439_v59  ;;  %v633_v59 = vld [vmem:[#allocation2 + $0xa50] sm:$0xff]  ;;  %v634_v60 = vld [vmem:[#allocation2 + $0xa68] sm:$0xff] }
  0x64   :  { %v1750_v61 = vpack.c.bf16 %v634_v60, %v633_v59  ;;  %v809_v59 = vld [vmem:[#allocation2 + $0xd50] sm:$0xff]  ;;  %v810_v60 = vld [vmem:[#allocation2 + $0xd68] sm:$0xff] }
  0x65   :  { %1647 = vmatpush1.bf16.msra.mxu0 %v1646_v63 }
  0x66   :  { %1673 = vmatprep.subr.bf16.mxu0 %v1672_v6 }
 0x11b   :  { %v126_v34 = vpop.f32.mrb[0].mxu0 }
 0x11c   :  { %v127_v35 = vadd.f32 %v126_v34, %v59_v31  ;;  %v1287_v36 = vpop.f32.mrb[1].mxu0  ;;  %v1680_v31 = vpack.c.bf16 %v450_v26, %v449_v25  ;;  %v451_v34 = vld [vmem:[#allocation2 + $0x690] sm:$0xff] }
 0x11d   :  { %v1711_v36 = vpack.c.bf16 %v466_v30, %v465_v29 }
 0x11e   :  { %v130_v38 = vmax.f32 %v127_v35, 0.0  ;;  %v452_v35 = vld [vmem:[#allocation2 + $0x6a8] sm:$0xff] }
 0x11f   :  { %v1684_v40 = vpack.c.bf16 %v452_v35, %v451_v34  ;;  %v619_v34 = vld [vmem:[#allocation2 + $0x900] sm:$0xff]  ;;  %v620_v35 = vld [vmem:[#allocation2 + $0x918] sm:$0xff] }
 0x120   :  { %1321 = vmatmul.mubr.f32.vlgmr.msra.gmra.mrb[0].mxu1 %v130_v38  ;;  %v467_v38 = vld [vmem:[#allocation2 + $0x810] sm:$0xff] }
 0x121   :  { %1650 = vmatpush3.bf16.msra.mxu1 %v1649_v37  ;;  %1355 = vmatprep.mubr.msk.f32.mxu1 %vm1908_vm0, %v1909_v1  ;;  %v1682_v37 = vpack.c.bf16 %v434_v33, %v433_v32  ;;  %v1714_v45 = vpack.c.bf16 %v468_v39, %v467_v38  ;;  %v1729_v39 = vpack.c.bf16 %v620_v35, %v619_v34  ;;  %v796_v34 = vld [vmem:[#allocation2 + $0xc18] sm:$0xff]  ;;  %v797_v35 = vld [vmem:[#allocation2 + $0xc30] sm:$0xff] }
 0x122   :  { %1651 = vmatprep.subr.bf16.mxu1 %v1907_v0 }
 0x125   :  { %1653 = vmatpush3.bf16.msra.mxu1 %v1652_v41  ;;  %v435_v41 = vld [vmem:[#allocation2 + $0x510] sm:$0xff] }
 0x126   :  { %1654 = vmatprep.subr.bf16.mxu1 %v1907_v0  ;;  %v1686_v46 = vpack.c.bf16 %v436_v42, %v435_v41  ;;  %v621_v41 = vld [vmem:[#allocation2 + $0x930] sm:$0xff]  ;;  %v622_v42 = vld [vmem:[#allocation2 + $0x948] sm:$0xff] }
 0x129   :  { %1656 = vmatpush3.bf16.msra.mxu1 %v1655_v44  ;;  %v454_v44 = vld [vmem:[#allocation2 + $0x6d8] sm:$0xff] }
 0x12a   :  { %1657 = vmatprep.subr.bf16.mxu1 %v1907_v0  ;;  %v1688_v49 = vpack.c.bf16 %v454_v44, %v453_v43  ;;  %v1732_v43 = vpack.c.bf16 %v622_v42, %v621_v41  ;;  %v623_v44 = vld [vmem:[#allocation2 + $0x960] sm:$0xff]  ;;  %v801_v42 = vld [vmem:[#allocation2 + $0xc90] sm:$0xff] }
 0x12d   :  { %1659 = vmatpush3.bf16.msra.mxu1 %v1658_v47  ;;  %v469_v47 = vld [vmem:[#allocation2 + $0x840] sm:$0xff] }
 0x12e   :  { %1660 = vmatprep.subr.bf16.mxu1 %v1907_v0  ;;  %v1717_v54 = vpack.c.bf16 %v470_v48, %v469_v47  ;;  %v625_v47 = vld [vmem:[#allocation2 + $0x990] sm:$0xff]  ;;  %v626_v48 = vld [vmem:[#allocation2 + $0x9a8] sm:$0xff] }
 0x131   :  { %1662 = vmatpush3.bf16.msra.mxu1 %v1661_v50  ;;  %v437_v50 = vld [vmem:[#allocation2 + $0x540] sm:$0xff] }
 0x132   :  { %1663 = vmatprep.subr.bf16.mxu1 %v1907_v0  ;;  %v1690_v55 = vpack.c.bf16 %v438_v51, %v437_v50  ;;  %v627_v50 = vld [vmem:[#allocation2 + $0x9c0] sm:$0xff]  ;;  %v628_v51 = vld [vmem:[#allocation2 + $0x9d8] sm:$0xff] }
 0x135   :  { %1665 = vmatpush3.bf16.msra.mxu1 %v1664_v53  ;;  %v456_v53 = vld [vmem:[#allocation2 + $0x708] sm:$0xff] }
 0x136   :  { %1666 = vmatprep.subr.bf16.mxu1 %v1907_v0  ;;  %v1692_v58 = vpack.c.bf16 %v456_v53, %v455_v52  ;;  %v1741_v52 = vpack.c.bf16 %v628_v51, %v627_v50  ;;  %v629_v53 = vld [vmem:[#allocation2 + $0x9f0] sm:$0xff]  ;;  %v807_v51 = vld [vmem:[#allocation2 + $0xd20] sm:$0xff] }
 0x139   :  { %1668 = vmatpush3.bf16.msra.mxu1 %v1667_v56  ;;  %v471_v56 = vld [vmem:[#allocation2 + $0x870] sm:$0xff] }
 0x13a   :  { %1669 = vmatprep.subr.bf16.mxu1 %v1907_v0  ;;  %v1720_v63 = vpack.c.bf16 %v472_v57, %v471_v56  ;;  %v631_v56 = vld [vmem:[#allocation2 + $0xa20] sm:$0xff]  ;;  %v632_v57 = vld [vmem:[#allocation2 + $0xa38] sm:$0xff] }
 0x13d   :  { %1671 = vmatpush3.bf16.msra.mxu1 %v1670_v3  ;;  %v473_v3 = vld [vmem:[#allocation2 + $0x8a0] sm:$0xff] }
 0x13e   :  { %1704 = vmatprep.subr.bf16.mxu1 %v1907_v0  ;;  %v1723_v6 = vpack.c.bf16 %v474_v4, %v473_v3  ;;  %v710_v4 = vld [vmem:[#allocation2 + $0xac8] sm:$0xff] }
 0x1f3   :  { %v214_v12 = vpop.f32.mrb[0].mxu1 }
 0x1f4   :  { %v215_v15 = vadd.f32 %v214_v12, %v147_v7  ;;  %v1322_v16 = vpop.f32.mrb[1].mxu1  ;;  %v441_v7 = vld [vmem:[#allocation2 + $0x5a0] sm:$0xff]  ;;  %v1726_v12 = vpack.c.bf16 %v476_v11, %v475_v10  ;;  %v714_v10 = vld [vmem:[#allocation2 + $0xb28] sm:$0xff] }
 0x1f5   :  { %v1698_v9 = vpack.c.bf16 %v442_v8, %v441_v7  ;;  %v443_v16 = vld [vmem:[#allocation2 + $0x5d0] sm:$0xff]  ;;  %v712_v7 = vld [vmem:[#allocation2 + $0xaf8] sm:$0xff] }
 0x1f6   :  { %v218_v20 = vmax.f32 %v215_v15, 0.0  ;;  %v1700_v15 = vpack.c.bf16 %v460_v14, %v459_v13  ;;  %v716_v13 = vld [vmem:[#allocation2 + $0xb58] sm:$0xff] }
 0x1f8   :  { %350 = vmatmul.mubr.f32.vlgmr.msra.gmra.mrb[2].mxu0 %v218_v20  ;;  %1356 = vmatmul.mubr.f32.vlgmr.msra.gmra.mrb[2].mxu1 %v218_v20  ;;  %v271_v20 = vshrl.u32 %v270_v19, 7  ;;  %v720_v19 = vld [vmem:[#allocation2 + $0xbb8] sm:$0xff] }
 0x1f9   :  { %1706 = vmatpush3.bf16.msra.mxu1 %v1705_v17  ;;  %1675 = vmatpush3.bf16.msra.mxu0 %v1674_v18  ;;  %v444_v17 = vld [vmem:[#allocation2 + $0x5e8] sm:$0xff] }
 0x1fa   :  { %1707 = vmatprep.subr.bf16.mxu1 %v1907_v0  ;;  %1677 = vmatprep.subr.bf16.mxu0 %v1676_v22  ;;  %v1702_v18 = vpack.c.bf16 %v444_v17, %v443_v16  ;;  %v272_v21 = vsub.s32 0, %v271_v20  ;;  %v280_v22 = vsub.s32 2, %v271_v20  ;;  %v276_v24 = vsub.s32 1, %v271_v20  ;;  %v718_v16 = vld [vmem:[#allocation2 + $0xb88] sm:$0xff] }
 0x1fb   :  { %1390 = vmatprep.mubr.msk.f32.mxu1 %vm1908_vm0, %v1909_v1 }
 0x1fc   :  { %v273_v25 = vrot.slane %v268_v23, %v272_v21  ;;  %v281_v26 = vrot.slane %v268_v23, %v280_v22 }
 0x1fd   :  { %1709 = vmatpush3.bf16.msra.mxu1 %v1708_v27  ;;  %1679 = vmatpush3.bf16.msra.mxu0 %v1678_v28  ;;  %v277_v27 = vrot.slane %v268_v23, %v276_v24  ;;  %v477_v24 = vld [vmem:[#allocation4 + $0x3] ss:$0 sm:$0xff] }
 0x1fe   :  { %1710 = vmatprep.subr.bf16.mxu1 %v1907_v0  ;;  %1681 = vmatprep.subr.bf16.mxu0 %v1680_v31 }
 0x201   :  { %1712 = vmatpush3.bf16.msra.mxu1 %v1711_v36  ;;  %1683 = vmatpush3.bf16.msra.mxu0 %v1682_v37 }
 0x202   :  { %1713 = vmatprep.subr.bf16.mxu1 %v1907_v0  ;;  %1685 = vmatprep.subr.bf16.mxu0 %v1684_v40 }
 0x205   :  { %1715 = vmatpush3.bf16.msra.mxu1 %v1714_v45  ;;  %1687 = vmatpush3.bf16.msra.mxu0 %v1686_v46  ;;  %v624_v45 = vld [vmem:[#allocation2 + $0x978] sm:$0xff] }
 0x206   :  { %1716 = vmatprep.subr.bf16.mxu1 %v1907_v0  ;;  %1689 = vmatprep.subr.bf16.mxu0 %v1688_v49  ;;  %v1735_v46 = vpack.c.bf16 %v624_v45, %v623_v44  ;;  %v1738_v49 = vpack.c.bf16 %v626_v48, %v625_v47  ;;  %v803_v45 = vld [vmem:[#allocation2 + $0xcc0] sm:$0xff]  ;;  %v805_v48 = vld [vmem:[#allocation2 + $0xcf0] sm:$0xff] }
 0x209   :  { %1718 = vmatpush3.bf16.msra.mxu1 %v1717_v54  ;;  %1691 = vmatpush3.bf16.msra.mxu0 %v1690_v55  ;;  %v630_v54 = vld [vmem:[#allocation2 + $0xa08] sm:$0xff] }
 0x20a   :  { %1719 = vmatprep.subr.bf16.mxu1 %v1907_v0  ;;  %1693 = vmatprep.subr.bf16.mxu0 %v1692_v58  ;;  %v1744_v55 = vpack.c.bf16 %v630_v54, %v629_v53  ;;  %v1747_v58 = vpack.c.bf16 %v632_v57, %v631_v56  ;;  %v635_v54 = vld [vmem:[#allocation4 + $0x4] ss:$0 sm:$0xff] }
 0x20d   :  { %1721 = vmatpush3.bf16.msra.mxu1 %v1720_v63  ;;  %1695 = vmatpush3.bf16.msra.mxu0 %v1694_v2  ;;  %v708_v63 = vld [vmem:[#allocation2 + $0xa98] sm:$0xff]  ;;  %v709_v2 = vld [vmem:[#allocation2 + $0xab0] sm:$0xff] }
 0x20e   :  { %1722 = vmatprep.subr.bf16.mxu1 %v1907_v0  ;;  %1697 = vmatprep.subr.bf16.mxu0 %v1696_v5  ;;  %v1753_v3 = vpack.c.bf16 %v708_v63, %v707_v62  ;;  %v1756_v5 = vpack.c.bf16 %v710_v4, %v709_v2  ;;  %v883_v62 = vld [vmem:[#allocation2 + $0xd80] sm:$0xff]  ;;  %v884_v63 = vld [vmem:[#allocation2 + $0xd98] sm:$0xff]  ;;  %v885_v2 = vld [vmem:[#allocation2 + $0xdb0] sm:$0xff] }
 0x20f   :  { %v886_v4 = vld [vmem:[#allocation2 + $0xdc8] sm:$0xff] }
 0x211   :  { %1724 = vmatpush3.bf16.msra.mxu1 %v1723_v6  ;;  %1699 = vmatpush3.bf16.msra.mxu0 %v1698_v9  ;;  %v711_v6 = vld [vmem:[#allocation2 + $0xae0] sm:$0xff]  ;;  %v713_v9 = vld [vmem:[#allocation2 + $0xb10] sm:$0xff] }
 0x212   :  { %1725 = vmatprep.subr.bf16.mxu1 %v1907_v0  ;;  %1701 = vmatprep.subr.bf16.mxu0 %v1700_v15  ;;  %v1759_v8 = vpack.c.bf16 %v712_v7, %v711_v6  ;;  %v1762_v11 = vpack.c.bf16 %v714_v10, %v713_v9  ;;  %v717_v15 = vld [vmem:[#allocation2 + $0xb70] sm:$0xff]  ;;  %v887_v6 = vld [vmem:[#allocation2 + $0xde0] sm:$0xff]  ;;  %v888_v7 = vld [vmem:[#allocation2 + $0xdf8] sm:$0xff] }
 0x213   :  { %v1768_v17 = vpack.c.bf16 %v718_v16, %v717_v15  ;;  %v889_v9 = vld [vmem:[#allocation2 + $0xe10] sm:$0xff]  ;;  %v890_v10 = vld [vmem:[#allocation2 + $0xe28] sm:$0xff] }
 0x214   :  { %v893_v15 = vld [vmem:[#allocation2 + $0xe70] sm:$0xff]  ;;  %v894_v16 = vld [vmem:[#allocation2 + $0xe88] sm:$0xff] }
 0x215   :  { %1727 = vmatpush3.bf16.msra.mxu1 %v1726_v12  ;;  %1703 = vmatpush3.bf16.msra.mxu0 %v1702_v18  ;;  %v715_v12 = vld [vmem:[#allocation2 + $0xb40] sm:$0xff] }
 0x216   :  { %1752 = vmatprep.subr.bf16.mxu1 %v1907_v0  ;;  %1728 = vmatprep.subr.bf16.mxu0 %v1907_v0  ;;  %v1765_v14 = vpack.c.bf16 %v716_v13, %v715_v12  ;;  %v719_v18 = vld [vmem:[#allocation2 + $0xba0] sm:$0xff]  ;;  %v892_v13 = vld [vmem:[#allocation2 + $0xe58] sm:$0xff] }
 0x217   :  { %v1771_v20 = vpack.c.bf16 %v720_v19, %v719_v18  ;;  %v891_v12 = vld [vmem:[#allocation2 + $0xe40] sm:$0xff]  ;;  %v896_v19 = vld [vmem:[#allocation2 + $0xeb8] sm:$0xff] }
 0x218   :  { %v895_v18 = vld [vmem:[#allocation2 + $0xea0] sm:$0xff] }
 0x2cb   :  { %v351_v28 = vpop.f32.mrb[2].mxu0  ;;  %v422_v29 = vpop.f32.mrb[2].mxu1 }
 0x2cc   :  { %v352_v30 = vadd.f32 %v351_v28, %v273_v25  ;;  %v423_v31 = vadd.f32 %v422_v29, %v281_v26  ;;  %v353_v32 = vpop.f32.mrb[3].mxu0  ;;  %v1357_v33 = vpop.f32.mrb[3].mxu1 }
 0x2cd   :  { %v354_v36 = vadd.f32 %v353_v32, %v277_v27  ;;  %v795_v33 = vld [vmem:[#allocation2 + $0xc00] sm:$0xff] }
 0x2ce   :  { %v428_v37 = vmax.f32 %v423_v31, 0.0  ;;  %v426_v40 = vmax.f32 %v352_v30, 0.0  ;;  %v721_v30 = vld [vmem:[#allocation2 + $0xbd0] sm:$0xff]  ;;  %v722_v31 = vld [vmem:[#allocation2 + $0xbe8] sm:$0xff] }
 0x2cf   :  { %v427_v38 = vmax.f32 %v354_v36, 0.0  ;;  %v1774_v32 = vpack.c.bf16 %v722_v31, %v721_v30  ;;  %v1777_v36 = vpack.c.bf16 %v796_v34, %v795_v33  ;;  %v972_v30 = vld [vmem:[#allocation2 + $0xf18] sm:$0xff]  ;;  %v973_v31 = vld [vmem:[#allocation2 + $0xf30] sm:$0xff]  ;;  %v974_v33 = vld [vmem:[#allocation2 + $0xf48] sm:$0xff] }
 0x2d0   :  { %1391 = vmatmul.mubr.f32.vlgmr.msra.gmra.mrb[4].mxu1 %v428_v37  ;;  %v798_v37 = vld [vmem:[#allocation2 + $0xc48] sm:$0xff]  ;;  %v1828_v34 = vpack.c.bf16 %v974_v33, %v973_v31 }
 0x2d1   :  { %542 = vmatprep.mubr.f32.mxu0 %v427_v38  ;;  %1460 = vmatprep.mubr.msk.f32.mxu1 %vm1908_vm0, %v1909_v1  ;;  %v1780_v38 = vpack.c.bf16 %v798_v37, %v797_v35  ;;  %v975_v35 = vld [vmem:[#allocation2 + $0xf60] sm:$0xff] }
 0x2d2   :  { %543 = vmatmul.mubr.f32.vlgmr.msra.gmra.mrb[4].mxu0 %v426_v40  ;;  %1754 = vmatpush3.bf16.msra.mxu1 %v1753_v3  ;;  %v800_v40 = vld [vmem:[#allocation2 + $0xc78] sm:$0xff]  ;;  %v1801_v3 = vpack.c.bf16 %v884_v63, %v883_v62 }
 0x2d3   :  { %1730 = vmatpush3.bf16.msra.mxu0 %v1729_v39  ;;  %1425 = vmatprep.mubr.msk.f32.mxu0 %vm1908_vm0, %v1909_v1  ;;  %v799_v39 = vld [vmem:[#allocation2 + $0xc60] sm:$0xff]  ;;  %v987_v62 = vld [vmem:[#allocation4 + $0x18] ss:$0 sm:$0xff] }
 0x2d4   :  { %1731 = vmatprep.subr.bf16.mxu0 %v1907_v0  ;;  %1755 = vmatprep.subr.bf16.mxu1 %v1907_v0  ;;  %v1783_v41 = vpack.c.bf16 %v800_v40, %v799_v39  ;;  %v979_v40 = vld [vmem:[#allocation2 + $0xfc0] sm:$0xff] }
 0x2d6   :  { %1757 = vmatpush3.bf16.msra.mxu1 %v1756_v5  ;;  %v1804_v5 = vpack.c.bf16 %v886_v4, %v885_v2 }
 0x2d7   :  { %1733 = vmatpush3.bf16.msra.mxu0 %v1732_v43  ;;  %1758 = vmatprep.subr.bf16.mxu1 %v1907_v0  ;;  %v802_v43 = vld [vmem:[#allocation2 + $0xca8] sm:$0xff] }
 0x2d8   :  { %1734 = vmatprep.subr.bf16.mxu0 %v1907_v0  ;;  %v1786_v44 = vpack.c.bf16 %v802_v43, %v801_v42  ;;  %v981_v43 = vld [vmem:[#allocation2 + $0xff0] sm:$0xff] }
 0x2da   :  { %1760 = vmatpush3.bf16.msra.mxu1 %v1759_v8  ;;  %v1807_v8 = vpack.c.bf16 %v888_v7, %v887_v6 }
 0x2db   :  { %1736 = vmatpush3.bf16.msra.mxu0 %v1735_v46  ;;  %1761 = vmatprep.subr.bf16.mxu1 %v1907_v0  ;;  %v804_v46 = vld [vmem:[#allocation2 + $0xcd8] sm:$0xff] }
 0x2dc   :  { %1737 = vmatprep.subr.bf16.mxu0 %v1907_v0  ;;  %v1789_v47 = vpack.c.bf16 %v804_v46, %v803_v45  ;;  %v983_v46 = vld [vmem:[#allocation2 + $0x1020] sm:$0xff] }
 0x2de   :  { %1763 = vmatpush3.bf16.msra.mxu1 %v1762_v11  ;;  %v1810_v11 = vpack.c.bf16 %v890_v10, %v889_v9 }
 0x2df   :  { %1739 = vmatpush3.bf16.msra.mxu0 %v1738_v49  ;;  %1764 = vmatprep.subr.bf16.mxu1 %v1907_v0  ;;  %v806_v49 = vld [vmem:[#allocation2 + $0xd08] sm:$0xff] }
 0x2e0   :  { %1740 = vmatprep.subr.bf16.mxu0 %v1907_v0  ;;  %v1792_v50 = vpack.c.bf16 %v806_v49, %v805_v48  ;;  %v811_v49 = vld [vmem:[#allocation4 + $0x6] ss:$0 sm:$0xff] }
 0x2e2   :  { %1766 = vmatpush3.bf16.msra.mxu1 %v1765_v14  ;;  %v1813_v14 = vpack.c.bf16 %v892_v13, %v891_v12 }
 0x2e3   :  { %1742 = vmatpush3.bf16.msra.mxu0 %v1741_v52  ;;  %1767 = vmatprep.subr.bf16.mxu1 %v1907_v0  ;;  %v808_v52 = vld [vmem:[#allocation2 + $0xd38] sm:$0xff] }
 0x2e4   :  { %1743 = vmatprep.subr.bf16.mxu0 %v1907_v0  ;;  %v1795_v53 = vpack.c.bf16 %v808_v52, %v807_v51 }
 0x2e6   :  { %1769 = vmatpush3.bf16.msra.mxu1 %v1768_v17  ;;  %v1816_v17 = vpack.c.bf16 %v894_v16, %v893_v15 }
 0x2e7   :  { %1745 = vmatpush3.bf16.msra.mxu0 %v1744_v55  ;;  %1770 = vmatprep.subr.bf16.mxu1 %v1907_v0 }
 0x2e8   :  { %1746 = vmatprep.subr.bf16.mxu0 %v1907_v0 }
 0x2ea   :  { %1772 = vmatpush3.bf16.msra.mxu1 %v1771_v20  ;;  %v1819_v20 = vpack.c.bf16 %v896_v19, %v895_v18 }
 0x2eb   :  { %1748 = vmatpush3.bf16.msra.mxu0 %v1747_v58  ;;  %1773 = vmatprep.subr.bf16.mxu1 %v1907_v0 }
 0x2ec   :  { %1749 = vmatprep.subr.bf16.mxu0 %v1907_v0 }
 0x2ee   :  { %1775 = vmatpush3.bf16.msra.mxu1 %v1774_v32 }
 0x2ef   :  { %1751 = vmatpush3.bf16.msra.mxu0 %v1750_v61  ;;  %1800 = vmatprep.subr.bf16.mxu1 %v1907_v0  ;;  %v1798_v61 = vpack.c.bf16 %v810_v60, %v809_v59 }
 0x2f0   :  { %1776 = vmatprep.subr.bf16.mxu0 %v1907_v0 }
 0x3a3   :  { %v614_v21 = vpop.f32.mrb[4].mxu1 }
 0x3a4   :  { %v1392_v22 = vpop.f32.mrb[5].mxu1 }
 0x3a5   :  { %v1148_v23 = vpop.f32.mrb[4].mxu0 }
 0x3a6   :  { %v1149_v25 = vpop.f32.mrb[5].mxu0 }
 0x3a7   :  { %v1150_v26 = vadd.f32 %v1149_v25, %v1148_v23 }
 0x3a9   :  { %v545_v27 = vadd.f32 %v1150_v26, %v477_v24  ;;  %v897_v26 = vld [vmem:[#allocation2 + $0xed0] sm:$0xff] }
 0x3ab   :  { %v615_v28 = vadd.f32 %v614_v21, %v545_v27  ;;  %v723_v21 = vld [vmem:[#allocation4 + $0x5] ss:$0 sm:$0xff]  ;;  %v898_v27 = vld [vmem:[#allocation2 + $0xee8] sm:$0xff] }
 0x3ad   :  { %v618_v29 = vmax.f32 %v615_v28, 0.0  ;;  %v1822_v28 = vpack.c.bf16 %v898_v27, %v897_v26 }
 0x3af   :  { %1426 = vmatmul.mubr.f32.vlgmr.msra.gmra.mrb[6].mxu0 %v618_v29  ;;  %v971_v29 = vld [vmem:[#allocation2 + $0xf00] sm:$0xff] }
 0x3b0   :  { %1495 = vmatprep.mubr.msk.f32.mxu0 %vm1908_vm0, %v1909_v1  ;;  %1778 = vmatpush3.bf16.msra.mxu0 %v1777_v36  ;;  %v1825_v32 = vpack.c.bf16 %v972_v30, %v971_v29  ;;  %v976_v36 = vld [vmem:[#allocation2 + $0xf78] sm:$0xff] }
 0x3b1   :  { %1779 = vmatprep.subr.bf16.mxu0 %v1907_v0  ;;  %v1831_v37 = vpack.c.bf16 %v976_v36, %v975_v35 }
 0x3b4   :  { %1781 = vmatpush3.bf16.msra.mxu0 %v1780_v38  ;;  %v978_v38 = vld [vmem:[#allocation2 + $0xfa8] sm:$0xff] }
 0x3b5   :  { %1782 = vmatprep.subr.bf16.mxu0 %v1907_v0 }
 0x3b8   :  { %1784 = vmatpush3.bf16.msra.mxu0 %v1783_v41  ;;  %v980_v41 = vld [vmem:[#allocation2 + $0xfd8] sm:$0xff] }
 0x3b9   :  { %1785 = vmatprep.subr.bf16.mxu0 %v1907_v0  ;;  %v1837_v42 = vpack.c.bf16 %v980_v41, %v979_v40 }
 0x3bc   :  { %1787 = vmatpush3.bf16.msra.mxu0 %v1786_v44  ;;  %v982_v44 = vld [vmem:[#allocation2 + $0x1008] sm:$0xff] }
 0x3bd   :  { %1788 = vmatprep.subr.bf16.mxu0 %v1907_v0  ;;  %v1840_v45 = vpack.c.bf16 %v982_v44, %v981_v43 }
 0x3c0   :  { %1790 = vmatpush3.bf16.msra.mxu0 %v1789_v47  ;;  %v984_v47 = vld [vmem:[#allocation2 + $0x1038] sm:$0xff] }
 0x3c1   :  { %1791 = vmatprep.subr.bf16.mxu0 %v1907_v0  ;;  %v1843_v48 = vpack.c.bf16 %v984_v47, %v983_v46 }
 0x3c4   :  { %1793 = vmatpush3.bf16.msra.mxu0 %v1792_v50 }
 0x3c5   :  { %1794 = vmatprep.subr.bf16.mxu0 %v1907_v0 }
 0x3c8   :  { %1796 = vmatpush3.bf16.msra.mxu0 %v1795_v53 }
 0x3c9   :  { %1797 = vmatprep.subr.bf16.mxu0 %v1907_v0 }
 0x3cc   :  { %1799 = vmatpush3.bf16.msra.mxu0 %v1798_v61 }
 0x3cd   :  { %1824 = vmatprep.subr.bf16.mxu0 %v1907_v0 }
 0x482   :  { %v702_v55 = vpop.f32.mrb[6].mxu0 }
 0x483   :  { %v703_v56 = vadd.f32 %v702_v55, %v635_v54  ;;  %v1427_v57 = vpop.f32.mrb[7].mxu0  ;;  %v985_v54 = vld [vmem:[#allocation2 + $0x1050] sm:$0xff]  ;;  %v986_v55 = vld [vmem:[#allocation2 + $0x1068] sm:$0xff] }
 0x484   :  { %v899_v57 = vld [vmem:[#allocation4 + $0x7] ss:$0 sm:$0xff] }
 0x485   :  { %v706_v58 = vmax.f32 %v703_v56, 0.0  ;;  %v1846_v56 = vpack.c.bf16 %v986_v55, %v985_v54 }
 0x487   :  { %1461 = vmatmul.mubr.f32.vlgmr.msra.gmra.mrb[6].mxu1 %v706_v58 }
 0x488   :  { %1530 = vmatprep.mubr.msk.f32.mxu1 %vm1908_vm0, %v1909_v1  ;;  %1802 = vmatpush3.bf16.msra.mxu1 %v1801_v3 }
 0x489   :  { %1803 = vmatprep.subr.bf16.mxu1 %v1907_v0 }
 0x48c   :  { %1805 = vmatpush3.bf16.msra.mxu1 %v1804_v5 }
 0x48d   :  { %1806 = vmatprep.subr.bf16.mxu1 %v1907_v0 }
 0x490   :  { %1808 = vmatpush3.bf16.msra.mxu1 %v1807_v8 }
 0x491   :  { %1809 = vmatprep.subr.bf16.mxu1 %v1907_v0 }
 0x494   :  { %1811 = vmatpush3.bf16.msra.mxu1 %v1810_v11 }
 0x495   :  { %1812 = vmatprep.subr.bf16.mxu1 %v1907_v0 }
 0x498   :  { %1814 = vmatpush3.bf16.msra.mxu1 %v1813_v14 }
 0x499   :  { %1815 = vmatprep.subr.bf16.mxu1 %v1907_v0 }
 0x49c   :  { %1817 = vmatpush3.bf16.msra.mxu1 %v1816_v17 }
 0x49d   :  { %1818 = vmatprep.subr.bf16.mxu1 %v1907_v0 }
 0x4a0   :  { %1820 = vmatpush3.bf16.msra.mxu1 %v1819_v20 }
 0x4a1   :  { %1821 = vmatprep.subr.bf16.mxu1 %v1907_v0 }
 0x4a4   :  { %1823 = vmatpush3.bf16.msra.mxu1 %v1822_v28 }
 0x55a   :  { %v790_v22 = vpop.f32.mrb[6].mxu1 }
 0x55b   :  { %v791_v23 = vadd.f32 %v790_v22, %v723_v21  ;;  %v1462_v24 = vpop.f32.mrb[7].mxu1 }
 0x55d   :  { %v794_v25 = vmax.f32 %v791_v23, 0.0 }
 0x55f   :  { %1496 = vmatmul.mubr.f32.vlgmr.msra.gmra.mrb[8].mxu0 %v794_v25 }
 0x560   :  { %1565 = vmatprep.mubr.msk.f32.mxu0 %vm1908_vm0, %v1909_v1  ;;  %1826 = vmatpush3.bf16.msra.mxu0 %v1825_v32  ;;  %v977_v1 = vld [vmem:[#allocation2 + $0xf90] sm:$0xff] }
 0x561   :  { %1827 = vmatprep.subr.bf16.mxu0 %v1907_v0  ;;  %v1834_v39 = vpack.c.bf16 %v978_v38, %v977_v1 }
 0x564   :  { %1829 = vmatpush3.bf16.msra.mxu0 %v1828_v34 }
 0x565   :  { %1830 = vmatprep.subr.bf16.mxu0 %v1907_v0 }
 0x568   :  { %1832 = vmatpush3.bf16.msra.mxu0 %v1831_v37 }
 0x569   :  { %1833 = vmatprep.subr.bf16.mxu0 %v1907_v0 }
 0x56c   :  { %1835 = vmatpush3.bf16.msra.mxu0 %v1834_v39 }
 0x56d   :  { %1836 = vmatprep.subr.bf16.mxu0 %v1907_v0 }
 0x570   :  { %1838 = vmatpush3.bf16.msra.mxu0 %v1837_v42 }
 0x571   :  { %1839 = vmatprep.subr.bf16.mxu0 %v1907_v0 }
 0x574   :  { %1841 = vmatpush3.bf16.msra.mxu0 %v1840_v45 }
 0x575   :  { %1842 = vmatprep.subr.bf16.mxu0 %v1907_v0 }
 0x578   :  { %1844 = vmatpush3.bf16.msra.mxu0 %v1843_v48 }
 0x579   :  { %1845 = vmatprep.subr.bf16.mxu0 %v1907_v0 }
 0x57c   :  { %1847 = vmatpush3.bf16.msra.mxu0 %v1846_v56 }
 0x632   :  { %v878_v50 = vpop.f32.mrb[8].mxu0 }
 0x633   :  { %v879_v51 = vadd.f32 %v878_v50, %v811_v49  ;;  %v1497_v52 = vpop.f32.mrb[9].mxu0 }
 0x635   :  { %v882_v53 = vmax.f32 %v879_v51, 0.0 }
 0x637   :  { %1531 = vmatmul.mubr.f32.vlgmr.msra.gmra.mrb[8].mxu1 %v882_v53 }
 0x70a   :  { %v966_v58 = vpop.f32.mrb[8].mxu1 }
 0x70b   :  { %v967_v59 = vadd.f32 %v966_v58, %v899_v57  ;;  %v1532_v60 = vpop.f32.mrb[9].mxu1 }
 0x70d   :  { %v970_v61 = vmax.f32 %v967_v59, 0.0 }
 0x70f   :  { %1566 = vmatmul.mubr.f32.vlgmr.msra.gmra.mrb[10].mxu0 %v970_v61 }
 0x7e2   :  { %v1054_v63 = vpop.f32.mrb[10].mxu0 }
 0x7e3   :  { %v1055_v2 = vadd.f32 %v1054_v63, %v987_v62  ;;  %v1567_v0 = vpop.f32.mrb[11].mxu0 }
 0x7e5   :  { %1058 = vst [vmem:[%s2054_s3] sm:$0xff] %v1055_v2 }
 0x7e6   :  { %1063 = vsyncpa [#allocation3], 1 }
 0x7e7   :  { %1064 = vsyncpa [#allocation5], 1 }

</bundles_post_ra>
